<compile_context>
chip_gen: v7x
topology: tpu7x:2x2x1
jax: 0.10.0
libtpu: 0.0.40
codegen_flags: <defaults>
</compile_context>

<pallas_src>
import functools

import jax
import jax.numpy as jnp
from jax.experimental import pallas as pl
from jax.experimental.pallas import tpu as pltpu

# ---- packed-parameter layout (flat f32 SMEM array) --------------------------
# w1 stored as [in=2, out=8]  (torch W1.T):  w1[i, j] = params[W1_OFF + i*8 + j]
# b1 [8]                                  :  b1[j]    = params[B1_OFF + j]
# w2 stored as [in=8, out=2]  (torch W2.T):  w2[j, k] = params[W2_OFF + j*2 + k]
# b2 [2]                                  :  b2[k]    = params[B2_OFF + k]
W1_OFF, B1_OFF, W2_OFF, B2_OFF = 0, 16, 24, 40
PARAMS_LEN = 48  # 42 used, padded to 48

NEG_SLOPE = 0.01


def fused_net_kernel(params_ref, x_ref, noise_ref, out_ref, out1_ref):
    """block(x) and block(x + noise) in one body.

    x_ref/noise_ref/out_ref/out1_ref : (2, TILE) f32 VMEM tiles (lane-dense).
    params_ref                       : (48,) f32 in SMEM (scalar reads).
    """
    x = x_ref[...]                       # (2, TILE) f32
    sx = x + noise_ref[...]              # noisy branch, fused add

    def mlp(v, o_ref):
        x0 = v[0:1, :]                   # (1, TILE)
        x1 = v[1:2, :]

        # fc1: h_j = w1[0,j]*x0 + w1[1,j]*x1 + b1[j]   then leaky_relu(0.01)
        h = []
        for j in range(8):
            hj = (x0 * params_ref[W1_OFF + j]
                  + x1 * params_ref[W1_OFF + 8 + j]
                  + params_ref[B1_OFF + j])
            h.append(jnp.where(hj > 0, hj, NEG_SLOPE * hj))

        # fc2: out_k = sum_j h_j * w2[j,k] + b2[k]     then leaky_relu(0.01)
        for k in range(2):
            acc = h[0] * params_ref[W2_OFF + k] + params_ref[B2_OFF + k]
            for j in range(1, 8):
                acc = acc + h[j] * params_ref[W2_OFF + 2 * j + k]
            o_ref[k:k + 1, :] = jnp.where(acc > 0, acc, NEG_SLOPE * acc)

    mlp(x, out_ref)
    mlp(sx, out1_ref)


def _fused_net_call(params_packed, x_t, noise_t):
    """params_packed: (48,) f32; x_t, noise_t: (2, Npad) f32 lane-dense."""
    fin, npad = x_t.shape
    tile = 512 if npad % 512 == 0 else 128     # lane tile; keeps VMEM tiny on v7x too
    grid = (npad // tile,)

    vmem_spec = pl.BlockSpec((fin, tile), lambda i: (0, i))
    return pl.pallas_call(
        fused_net_kernel,
        out_shape=(jax.ShapeDtypeStruct((fin, npad), jnp.float32),
                   jax.ShapeDtypeStruct((fin, npad), jnp.float32)),
        grid=grid,
        in_specs=[
            pl.BlockSpec(memory_space=pltpu.MemorySpace.SMEM),  # packed params
            vmem_spec,                                          # x      [2, Npad]
            vmem_spec,                                          # noise  [2, Npad]
        ],
        out_specs=(vmem_spec, vmem_spec),                       # out, out1
        compiler_params=pltpu.CompilerParams(
            dimension_semantics=("parallel",)),                 # v7x: 2 TCs split the grid
    )(params_packed, x_t, noise_t)


# -------------------------- parameters --------------------------------------
def init_params(key):
    """torch.nn.Linear-style init: U(-1/sqrt(fan_in), 1/sqrt(fan_in))."""
    k1, k2, k3, k4 = jax.random.split(key, 4)
    lim1 = 1.0 / jnp.sqrt(2.0)
    lim2 = 1.0 / jnp.sqrt(8.0)
    w1 = jax.random.uniform(k1, (2, 8), jnp.float32, -lim1, lim1)  # [in, out]
    b1 = jax.random.uniform(k2, (8,), jnp.float32, -lim1, lim1)
    w2 = jax.random.uniform(k3, (8, 2), jnp.float32, -lim2, lim2)  # [in, out]
    b2 = jax.random.uniform(k4, (2,), jnp.float32, -lim2, lim2)
    return w1, b1, w2, b2


def pack_params(w1, b1, w2, b2):
    flat = jnp.concatenate(
        [w1.reshape(-1), b1.reshape(-1), w2.reshape(-1), b2.reshape(-1)])
    return jnp.zeros((PARAMS_LEN,), jnp.float32).at[:flat.shape[0]].set(flat)


# -------------------------- forward -----------------------------------------
@functools.partial(jax.jit, static_argnums=())
def net_forward(data, params_packed, noise_key):
    """Equivalent of net.forward(data) -> (out, out1)."""
    x = data[0]                                    # [N, 2]
    n, fin = x.shape
    npad = max(128, -(-n // 128) * 128)            # pad batch onto 128 lanes

    # lane-dense layout: features on sublanes, batch on lanes
    x_t = jnp.zeros((fin, npad), jnp.float32).at[:, :n].set(x.T)
    # s_x = x + sqrt(0.1) * randn(...)  (drawn directly in the padded layout)
    noise_t = (0.1 ** 0.5) * jax.random.normal(
        noise_key, (fin, npad), dtype=jnp.float32)

    out_t, out1_t = _fused_net_call(params_packed, x_t, noise_t)

    out = out_t[:, :n].T                           # back to [N, 2]
    out1 = out1_t[:, :n].T
    return out, out1


if __name__ == "__main__":
    key = jax.random.PRNGKey(0)
    k_param, k_data, k_noise = jax.random.split(key, 3)

    w1, b1, w2, b2 = init_params(k_param)
    params_packed = pack_params(w1, b1, w2, b2)

    # data: [B=2, N=8, 2]; forward uses x = data[0] of shape [8, 2]
    data = jax.random.normal(k_data, (2, 8, 2), dtype=jnp.float32)

    out, out1 = net_forward(data, params_packed, k_noise)
    jax.block_until_ready((out, out1))

    assert out.shape == (8, 2) and out1.shape == (8, 2)

    # pure-JAX reference for the deterministic (clean) branch
    def ref_block(v):
        h = v @ w1 + b1
        h = jnp.where(h > 0, h, NEG_SLOPE * h)
        o = h @ w2 + b2
        return jnp.where(o > 0, o, NEG_SLOPE * o)

    ref_out = ref_block(data[0])
    assert jnp.allclose(out, ref_out, atol=1e-5, rtol=1e-5), "clean branch mismatch"
    assert bool(jnp.all(jnp.isfinite(out1))), "noisy branch produced non-finite values"

    print("KERNEL_OK")
</pallas_src>

<mosaic_0001>
module attributes {stable_mosaic.version = 11 : i64} {
  func.func @fused_net_kernel(%arg0: i32, %arg1: memref<48xf32, #tpu.memory_space<smem>>, %arg2: memref<2x128xf32, #tpu.memory_space<vmem>>, %arg3: memref<2x128xf32, #tpu.memory_space<vmem>>, %arg4: memref<2x128xf32, #tpu.memory_space<vmem>>, %arg5: memref<2x128xf32, #tpu.memory_space<vmem>>) attributes {dimension_semantics = [#tpu.dimension_semantics<parallel>], iteration_bounds = array<i64: 1>, scalar_prefetch = 0 : i64, scratch_operands = 0 : i64, tpu.core_type = #tpu.core_type<tc>, window_params = [{transform_indices = @transform_0, window_bounds = array<i64: 48>}, {transform_indices = @transform_1, window_bounds = array<i64: 2, 128>}, {transform_indices = @transform_2, window_bounds = array<i64: 2, 128>}, {transform_indices = @transform_3, window_bounds = array<i64: 2, 128>}, {transform_indices = @transform_4, window_bounds = array<i64: 2, 128>}]} {
    %c0 = arith.constant 0 : index
    %c0_0 = arith.constant 0 : index
    %0 = vector.load %arg2[%c0, %c0_0] : memref<2x128xf32, #tpu.memory_space<vmem>>, vector<2x128xf32>
    %c0_1 = arith.constant 0 : index
    %c0_2 = arith.constant 0 : index
    %1 = vector.load %arg3[%c0_1, %c0_2] : memref<2x128xf32, #tpu.memory_space<vmem>>, vector<2x128xf32>
    %2 = arith.addf %0, %1 : vector<2x128xf32>
    %3 = vector.extract_strided_slice %0 {offsets = [0, 0], sizes = [1, 128], strides = [1, 1]} : vector<2x128xf32> to vector<1x128xf32>
    %4 = vector.extract_strided_slice %0 {offsets = [1, 0], sizes = [1, 128], strides = [1, 1]} : vector<2x128xf32> to vector<1x128xf32>
    %c0_3 = arith.constant 0 : index
    %5 = memref.load %arg1[%c0_3] : memref<48xf32, #tpu.memory_space<smem>>
    %6 = vector.broadcast %5 : f32 to vector<1x128xf32>
    %7 = arith.mulf %3, %6 : vector<1x128xf32>
    %c8 = arith.constant 8 : index
    %8 = memref.load %arg1[%c8] : memref<48xf32, #tpu.memory_space<smem>>
    %9 = vector.broadcast %8 : f32 to vector<1x128xf32>
    %10 = arith.mulf %4, %9 : vector<1x128xf32>
    %11 = arith.addf %7, %10 : vector<1x128xf32>
    %c16 = arith.constant 16 : index
    %12 = memref.load %arg1[%c16] : memref<48xf32, #tpu.memory_space<smem>>
    %13 = vector.broadcast %12 : f32 to vector<1x128xf32>
    %14 = arith.addf %11, %13 : vector<1x128xf32>
    %cst = arith.constant 0.000000e+00 : f32
    %15 = vector.broadcast %cst : f32 to vector<1x128xf32>
    %16 = arith.cmpf ogt, %14, %15 : vector<1x128xf32>
    %cst_4 = arith.constant 0.00999999977 : f32
    %17 = vector.broadcast %cst_4 : f32 to vector<1x128xf32>
    %18 = arith.mulf %17, %14 : vector<1x128xf32>
    %19 = arith.select %16, %14, %18 : vector<1x128xi1>, vector<1x128xf32>
    %c1 = arith.constant 1 : index
    %20 = memref.load %arg1[%c1] : memref<48xf32, #tpu.memory_space<smem>>
    %21 = vector.broadcast %20 : f32 to vector<1x128xf32>
    %22 = arith.mulf %3, %21 : vector<1x128xf32>
    %c9 = arith.constant 9 : index
    %23 = memref.load %arg1[%c9] : memref<48xf32, #tpu.memory_space<smem>>
    %24 = vector.broadcast %23 : f32 to vector<1x128xf32>
    %25 = arith.mulf %4, %24 : vector<1x128xf32>
    %26 = arith.addf %22, %25 : vector<1x128xf32>
    %c17 = arith.constant 17 : index
    %27 = memref.load %arg1[%c17] : memref<48xf32, #tpu.memory_space<smem>>
    %28 = vector.broadcast %27 : f32 to vector<1x128xf32>
    %29 = arith.addf %26, %28 : vector<1x128xf32>
    %cst_5 = arith.constant 0.000000e+00 : f32
    %30 = vector.broadcast %cst_5 : f32 to vector<1x128xf32>
    %31 = arith.cmpf ogt, %29, %30 : vector<1x128xf32>
    %cst_6 = arith.constant 0.00999999977 : f32
    %32 = vector.broadcast %cst_6 : f32 to vector<1x128xf32>
    %33 = arith.mulf %32, %29 : vector<1x128xf32>
    %34 = arith.select %31, %29, %33 : vector<1x128xi1>, vector<1x128xf32>
    %c2 = arith.constant 2 : index
    %35 = memref.load %arg1[%c2] : memref<48xf32, #tpu.memory_space<smem>>
    %36 = vector.broadcast %35 : f32 to vector<1x128xf32>
    %37 = arith.mulf %3, %36 : vector<1x128xf32>
    %c10 = arith.constant 10 : index
    %38 = memref.load %arg1[%c10] : memref<48xf32, #tpu.memory_space<smem>>
    %39 = vector.broadcast %38 : f32 to vector<1x128xf32>
    %40 = arith.mulf %4, %39 : vector<1x128xf32>
    %41 = arith.addf %37, %40 : vector<1x128xf32>
    %c18 = arith.constant 18 : index
    %42 = memref.load %arg1[%c18] : memref<48xf32, #tpu.memory_space<smem>>
    %43 = vector.broadcast %42 : f32 to vector<1x128xf32>
    %44 = arith.addf %41, %43 : vector<1x128xf32>
    %cst_7 = arith.constant 0.000000e+00 : f32
    %45 = vector.broadcast %cst_7 : f32 to vector<1x128xf32>
    %46 = arith.cmpf ogt, %44, %45 : vector<1x128xf32>
    %cst_8 = arith.constant 0.00999999977 : f32
    %47 = vector.broadcast %cst_8 : f32 to vector<1x128xf32>
    %48 = arith.mulf %47, %44 : vector<1x128xf32>
    %49 = arith.select %46, %44, %48 : vector<1x128xi1>, vector<1x128xf32>
    %c3 = arith.constant 3 : index
    %50 = memref.load %arg1[%c3] : memref<48xf32, #tpu.memory_space<smem>>
    %51 = vector.broadcast %50 : f32 to vector<1x128xf32>
    %52 = arith.mulf %3, %51 : vector<1x128xf32>
    %c11 = arith.constant 11 : index
    %53 = memref.load %arg1[%c11] : memref<48xf32, #tpu.memory_space<smem>>
    %54 = vector.broadcast %53 : f32 to vector<1x128xf32>
    %55 = arith.mulf %4, %54 : vector<1x128xf32>
    %56 = arith.addf %52, %55 : vector<1x128xf32>
    %c19 = arith.constant 19 : index
    %57 = memref.load %arg1[%c19] : memref<48xf32, #tpu.memory_space<smem>>
    %58 = vector.broadcast %57 : f32 to vector<1x128xf32>
    %59 = arith.addf %56, %58 : vector<1x128xf32>
    %cst_9 = arith.constant 0.000000e+00 : f32
    %60 = vector.broadcast %cst_9 : f32 to vector<1x128xf32>
    %61 = arith.cmpf ogt, %59, %60 : vector<1x128xf32>
    %cst_10 = arith.constant 0.00999999977 : f32
    %62 = vector.broadcast %cst_10 : f32 to vector<1x128xf32>
    %63 = arith.mulf %62, %59 : vector<1x128xf32>
    %64 = arith.select %61, %59, %63 : vector<1x128xi1>, vector<1x128xf32>
    %c4 = arith.constant 4 : index
    %65 = memref.load %arg1[%c4] : memref<48xf32, #tpu.memory_space<smem>>
    %66 = vector.broadcast %65 : f32 to vector<1x128xf32>
    %67 = arith.mulf %3, %66 : vector<1x128xf32>
    %c12 = arith.constant 12 : index
    %68 = memref.load %arg1[%c12] : memref<48xf32, #tpu.memory_space<smem>>
    %69 = vector.broadcast %68 : f32 to vector<1x128xf32>
    %70 = arith.mulf %4, %69 : vector<1x128xf32>
    %71 = arith.addf %67, %70 : vector<1x128xf32>
    %c20 = arith.constant 20 : index
    %72 = memref.load %arg1[%c20] : memref<48xf32, #tpu.memory_space<smem>>
    %73 = vector.broadcast %72 : f32 to vector<1x128xf32>
    %74 = arith.addf %71, %73 : vector<1x128xf32>
    %cst_11 = arith.constant 0.000000e+00 : f32
    %75 = vector.broadcast %cst_11 : f32 to vector<1x128xf32>
    %76 = arith.cmpf ogt, %74, %75 : vector<1x128xf32>
    %cst_12 = arith.constant 0.00999999977 : f32
    %77 = vector.broadcast %cst_12 : f32 to vector<1x128xf32>
    %78 = arith.mulf %77, %74 : vector<1x128xf32>
    %79 = arith.select %76, %74, %78 : vector<1x128xi1>, vector<1x128xf32>
    %c5 = arith.constant 5 : index
    %80 = memref.load %arg1[%c5] : memref<48xf32, #tpu.memory_space<smem>>
    %81 = vector.broadcast %80 : f32 to vector<1x128xf32>
    %82 = arith.mulf %3, %81 : vector<1x128xf32>
    %c13 = arith.constant 13 : index
    %83 = memref.load %arg1[%c13] : memref<48xf32, #tpu.memory_space<smem>>
    %84 = vector.broadcast %83 : f32 to vector<1x128xf32>
    %85 = arith.mulf %4, %84 : vector<1x128xf32>
    %86 = arith.addf %82, %85 : vector<1x128xf32>
    %c21 = arith.constant 21 : index
    %87 = memref.load %arg1[%c21] : memref<48xf32, #tpu.memory_space<smem>>
    %88 = vector.broadcast %87 : f32 to vector<1x128xf32>
    %89 = arith.addf %86, %88 : vector<1x128xf32>
    %cst_13 = arith.constant 0.000000e+00 : f32
    %90 = vector.broadcast %cst_13 : f32 to vector<1x128xf32>
    %91 = arith.cmpf ogt, %89, %90 : vector<1x128xf32>
    %cst_14 = arith.constant 0.00999999977 : f32
    %92 = vector.broadcast %cst_14 : f32 to vector<1x128xf32>
    %93 = arith.mulf %92, %89 : vector<1x128xf32>
    %94 = arith.select %91, %89, %93 : vector<1x128xi1>, vector<1x128xf32>
    %c6 = arith.constant 6 : index
    %95 = memref.load %arg1[%c6] : memref<48xf32, #tpu.memory_space<smem>>
    %96 = vector.broadcast %95 : f32 to vector<1x128xf32>
    %97 = arith.mulf %3, %96 : vector<1x128xf32>
    %c14 = arith.constant 14 : index
    %98 = memref.load %arg1[%c14] : memref<48xf32, #tpu.memory_space<smem>>
    %99 = vector.broadcast %98 : f32 to vector<1x128xf32>
    %100 = arith.mulf %4, %99 : vector<1x128xf32>
    %101 = arith.addf %97, %100 : vector<1x128xf32>
    %c22 = arith.constant 22 : index
    %102 = memref.load %arg1[%c22] : memref<48xf32, #tpu.memory_space<smem>>
    %103 = vector.broadcast %102 : f32 to vector<1x128xf32>
    %104 = arith.addf %101, %103 : vector<1x128xf32>
    %cst_15 = arith.constant 0.000000e+00 : f32
    %105 = vector.broadcast %cst_15 : f32 to vector<1x128xf32>
    %106 = arith.cmpf ogt, %104, %105 : vector<1x128xf32>
    %cst_16 = arith.constant 0.00999999977 : f32
    %107 = vector.broadcast %cst_16 : f32 to vector<1x128xf32>
    %108 = arith.mulf %107, %104 : vector<1x128xf32>
    %109 = arith.select %106, %104, %108 : vector<1x128xi1>, vector<1x128xf32>
    %c7 = arith.constant 7 : index
    %110 = memref.load %arg1[%c7] : memref<48xf32, #tpu.memory_space<smem>>
    %111 = vector.broadcast %110 : f32 to vector<1x128xf32>
    %112 = arith.mulf %3, %111 : vector<1x128xf32>
    %c15 = arith.constant 15 : index
    %113 = memref.load %arg1[%c15] : memref<48xf32, #tpu.memory_space<smem>>
    %114 = vector.broadcast %113 : f32 to vector<1x128xf32>
    %115 = arith.mulf %4, %114 : vector<1x128xf32>
    %116 = arith.addf %112, %115 : vector<1x128xf32>
    %c23 = arith.constant 23 : index
    %117 = memref.load %arg1[%c23] : memref<48xf32, #tpu.memory_space<smem>>
    %118 = vector.broadcast %117 : f32 to vector<1x128xf32>
    %119 = arith.addf %116, %118 : vector<1x128xf32>
    %cst_17 = arith.constant 0.000000e+00 : f32
    %120 = vector.broadcast %cst_17 : f32 to vector<1x128xf32>
    %121 = arith.cmpf ogt, %119, %120 : vector<1x128xf32>
    %cst_18 = arith.constant 0.00999999977 : f32
    %122 = vector.broadcast %cst_18 : f32 to vector<1x128xf32>
    %123 = arith.mulf %122, %119 : vector<1x128xf32>
    %124 = arith.select %121, %119, %123 : vector<1x128xi1>, vector<1x128xf32>
    %c24 = arith.constant 24 : index
    %125 = memref.load %arg1[%c24] : memref<48xf32, #tpu.memory_space<smem>>
    %126 = vector.broadcast %125 : f32 to vector<1x128xf32>
    %127 = arith.mulf %19, %126 : vector<1x128xf32>
    %c40 = arith.constant 40 : index
    %128 = memref.load %arg1[%c40] : memref<48xf32, #tpu.memory_space<smem>>
    %129 = vector.broadcast %128 : f32 to vector<1x128xf32>
    %130 = arith.addf %127, %129 : vector<1x128xf32>
    %c26 = arith.constant 26 : index
    %131 = memref.load %arg1[%c26] : memref<48xf32, #tpu.memory_space<smem>>
    %132 = vector.broadcast %131 : f32 to vector<1x128xf32>
    %133 = arith.mulf %34, %132 : vector<1x128xf32>
    %134 = arith.addf %130, %133 : vector<1x128xf32>
    %c28 = arith.constant 28 : index
    %135 = memref.load %arg1[%c28] : memref<48xf32, #tpu.memory_space<smem>>
    %136 = vector.broadcast %135 : f32 to vector<1x128xf32>
    %137 = arith.mulf %49, %136 : vector<1x128xf32>
    %138 = arith.addf %134, %137 : vector<1x128xf32>
    %c30 = arith.constant 30 : index
    %139 = memref.load %arg1[%c30] : memref<48xf32, #tpu.memory_space<smem>>
    %140 = vector.broadcast %139 : f32 to vector<1x128xf32>
    %141 = arith.mulf %64, %140 : vector<1x128xf32>
    %142 = arith.addf %138, %141 : vector<1x128xf32>
    %c32 = arith.constant 32 : index
    %143 = memref.load %arg1[%c32] : memref<48xf32, #tpu.memory_space<smem>>
    %144 = vector.broadcast %143 : f32 to vector<1x128xf32>
    %145 = arith.mulf %79, %144 : vector<1x128xf32>
    %146 = arith.addf %142, %145 : vector<1x128xf32>
    %c34 = arith.constant 34 : index
    %147 = memref.load %arg1[%c34] : memref<48xf32, #tpu.memory_space<smem>>
    %148 = vector.broadcast %147 : f32 to vector<1x128xf32>
    %149 = arith.mulf %94, %148 : vector<1x128xf32>
    %150 = arith.addf %146, %149 : vector<1x128xf32>
    %c36 = arith.constant 36 : index
    %151 = memref.load %arg1[%c36] : memref<48xf32, #tpu.memory_space<smem>>
    %152 = vector.broadcast %151 : f32 to vector<1x128xf32>
    %153 = arith.mulf %109, %152 : vector<1x128xf32>
    %154 = arith.addf %150, %153 : vector<1x128xf32>
    %c38 = arith.constant 38 : index
    %155 = memref.load %arg1[%c38] : memref<48xf32, #tpu.memory_space<smem>>
    %156 = vector.broadcast %155 : f32 to vector<1x128xf32>
    %157 = arith.mulf %124, %156 : vector<1x128xf32>
    %158 = arith.addf %154, %157 : vector<1x128xf32>
    %cst_19 = arith.constant 0.000000e+00 : f32
    %159 = vector.broadcast %cst_19 : f32 to vector<1x128xf32>
    %160 = arith.cmpf ogt, %158, %159 : vector<1x128xf32>
    %cst_20 = arith.constant 0.00999999977 : f32
    %161 = vector.broadcast %cst_20 : f32 to vector<1x128xf32>
    %162 = arith.mulf %161, %158 : vector<1x128xf32>
    %163 = arith.select %160, %158, %162 : vector<1x128xi1>, vector<1x128xf32>
    %c0_21 = arith.constant 0 : index
    %c0_22 = arith.constant 0 : index
    %164 = vector.load %arg4[%c0_21, %c0_22] : memref<2x128xf32, #tpu.memory_space<vmem>>, vector<1x128xf32>
    tpu.vector_store %arg4[%c0_21, %c0_22], %163 {strides = array<i32>} : memref<2x128xf32, #tpu.memory_space<vmem>>, vector<1x128xf32>,
    %c25 = arith.constant 25 : index
    %165 = memref.load %arg1[%c25] : memref<48xf32, #tpu.memory_space<smem>>
    %166 = vector.broadcast %165 : f32 to vector<1x128xf32>
    %167 = arith.mulf %19, %166 : vector<1x128xf32>
    %c41 = arith.constant 41 : index
    %168 = memref.load %arg1[%c41] : memref<48xf32, #tpu.memory_space<smem>>
    %169 = vector.broadcast %168 : f32 to vector<1x128xf32>
    %170 = arith.addf %167, %169 : vector<1x128xf32>
    %c27 = arith.constant 27 : index
    %171 = memref.load %arg1[%c27] : memref<48xf32, #tpu.memory_space<smem>>
    %172 = vector.broadcast %171 : f32 to vector<1x128xf32>
    %173 = arith.mulf %34, %172 : vector<1x128xf32>
    %174 = arith.addf %170, %173 : vector<1x128xf32>
    %c29 = arith.constant 29 : index
    %175 = memref.load %arg1[%c29] : memref<48xf32, #tpu.memory_space<smem>>
    %176 = vector.broadcast %175 : f32 to vector<1x128xf32>
    %177 = arith.mulf %49, %176 : vector<1x128xf32>
    %178 = arith.addf %174, %177 : vector<1x128xf32>
    %c31 = arith.constant 31 : index
    %179 = memref.load %arg1[%c31] : memref<48xf32, #tpu.memory_space<smem>>
    %180 = vector.broadcast %179 : f32 to vector<1x128xf32>
    %181 = arith.mulf %64, %180 : vector<1x128xf32>
    %182 = arith.addf %178, %181 : vector<1x128xf32>
    %c33 = arith.constant 33 : index
    %183 = memref.load %arg1[%c33] : memref<48xf32, #tpu.memory_space<smem>>
    %184 = vector.broadcast %183 : f32 to vector<1x128xf32>
    %185 = arith.mulf %79, %184 : vector<1x128xf32>
    %186 = arith.addf %182, %185 : vector<1x128xf32>
    %c35 = arith.constant 35 : index
    %187 = memref.load %arg1[%c35] : memref<48xf32, #tpu.memory_space<smem>>
    %188 = vector.broadcast %187 : f32 to vector<1x128xf32>
    %189 = arith.mulf %94, %188 : vector<1x128xf32>
    %190 = arith.addf %186, %189 : vector<1x128xf32>
    %c37 = arith.constant 37 : index
    %191 = memref.load %arg1[%c37] : memref<48xf32, #tpu.memory_space<smem>>
    %192 = vector.broadcast %191 : f32 to vector<1x128xf32>
    %193 = arith.mulf %109, %192 : vector<1x128xf32>
    %194 = arith.addf %190, %193 : vector<1x128xf32>
    %c39 = arith.constant 39 : index
    %195 = memref.load %arg1[%c39] : memref<48xf32, #tpu.memory_space<smem>>
    %196 = vector.broadcast %195 : f32 to vector<1x128xf32>
    %197 = arith.mulf %124, %196 : vector<1x128xf32>
    %198 = arith.addf %194, %197 : vector<1x128xf32>
    %cst_23 = arith.constant 0.000000e+00 : f32
    %199 = vector.broadcast %cst_23 : f32 to vector<1x128xf32>
    %200 = arith.cmpf ogt, %198, %199 : vector<1x128xf32>
    %cst_24 = arith.constant 0.00999999977 : f32
    %201 = vector.broadcast %cst_24 : f32 to vector<1x128xf32>
    %202 = arith.mulf %201, %198 : vector<1x128xf32>
    %203 = arith.select %200, %198, %202 : vector<1x128xi1>, vector<1x128xf32>
    %c1_25 = arith.constant 1 : index
    %c0_26 = arith.constant 0 : index
    %204 = vector.load %arg4[%c1_25, %c0_26] : memref<2x128xf32, #tpu.memory_space<vmem>>, vector<1x128xf32>
    tpu.vector_store %arg4[%c1_25, %c0_26], %203 {strides = array<i32>} : memref<2x128xf32, #tpu.memory_space<vmem>>, vector<1x128xf32>,
    %205 = vector.extract_strided_slice %2 {offsets = [0, 0], sizes = [1, 128], strides = [1, 1]} : vector<2x128xf32> to vector<1x128xf32>
    %206 = vector.extract_strided_slice %2 {offsets = [1, 0], sizes = [1, 128], strides = [1, 1]} : vector<2x128xf32> to vector<1x128xf32>
    %c0_27 = arith.constant 0 : index
    %207 = memref.load %arg1[%c0_27] : memref<48xf32, #tpu.memory_space<smem>>
    %208 = vector.broadcast %207 : f32 to vector<1x128xf32>
    %209 = arith.mulf %205, %208 : vector<1x128xf32>
    %c8_28 = arith.constant 8 : index
    %210 = memref.load %arg1[%c8_28] : memref<48xf32, #tpu.memory_space<smem>>
    %211 = vector.broadcast %210 : f32 to vector<1x128xf32>
    %212 = arith.mulf %206, %211 : vector<1x128xf32>
    %213 = arith.addf %209, %212 : vector<1x128xf32>
    %c16_29 = arith.constant 16 : index
    %214 = memref.load %arg1[%c16_29] : memref<48xf32, #tpu.memory_space<smem>>
    %215 = vector.broadcast %214 : f32 to vector<1x128xf32>
    %216 = arith.addf %213, %215 : vector<1x128xf32>
    %cst_30 = arith.constant 0.000000e+00 : f32
    %217 = vector.broadcast %cst_30 : f32 to vector<1x128xf32>
    %218 = arith.cmpf ogt, %216, %217 : vector<1x128xf32>
    %cst_31 = arith.constant 0.00999999977 : f32
    %219 = vector.broadcast %cst_31 : f32 to vector<1x128xf32>
    %220 = arith.mulf %219, %216 : vector<1x128xf32>
    %221 = arith.select %218, %216, %220 : vector<1x128xi1>, vector<1x128xf32>
    %c1_32 = arith.constant 1 : index
    %222 = memref.load %arg1[%c1_32] : memref<48xf32, #tpu.memory_space<smem>>
    %223 = vector.broadcast %222 : f32 to vector<1x128xf32>
    %224 = arith.mulf %205, %223 : vector<1x128xf32>
    %c9_33 = arith.constant 9 : index
    %225 = memref.load %arg1[%c9_33] : memref<48xf32, #tpu.memory_space<smem>>
    %226 = vector.broadcast %225 : f32 to vector<1x128xf32>
    %227 = arith.mulf %206, %226 : vector<1x128xf32>
    %228 = arith.addf %224, %227 : vector<1x128xf32>
    %c17_34 = arith.constant 17 : index
    %229 = memref.load %arg1[%c17_34] : memref<48xf32, #tpu.memory_space<smem>>
    %230 = vector.broadcast %229 : f32 to vector<1x128xf32>
    %231 = arith.addf %228, %230 : vector<1x128xf32>
    %cst_35 = arith.constant 0.000000e+00 : f32
    %232 = vector.broadcast %cst_35 : f32 to vector<1x128xf32>
    %233 = arith.cmpf ogt, %231, %232 : vector<1x128xf32>
    %cst_36 = arith.constant 0.00999999977 : f32
    %234 = vector.broadcast %cst_36 : f32 to vector<1x128xf32>
    %235 = arith.mulf %234, %231 : vector<1x128xf32>
    %236 = arith.select %233, %231, %235 : vector<1x128xi1>, vector<1x128xf32>
    %c2_37 = arith.constant 2 : index
    %237 = memref.load %arg1[%c2_37] : memref<48xf32, #tpu.memory_space<smem>>
    %238 = vector.broadcast %237 : f32 to vector<1x128xf32>
    %239 = arith.mulf %205, %238 : vector<1x128xf32>
    %c10_38 = arith.constant 10 : index
    %240 = memref.load %arg1[%c10_38] : memref<48xf32, #tpu.memory_space<smem>>
    %241 = vector.broadcast %240 : f32 to vector<1x128xf32>
    %242 = arith.mulf %206, %241 : vector<1x128xf32>
    %243 = arith.addf %239, %242 : vector<1x128xf32>
    %c18_39 = arith.constant 18 : index
    %244 = memref.load %arg1[%c18_39] : memref<48xf32, #tpu.memory_space<smem>>
    %245 = vector.broadcast %244 : f32 to vector<1x128xf32>
    %246 = arith.addf %243, %245 : vector<1x128xf32>
    %cst_40 = arith.constant 0.000000e+00 : f32
    %247 = vector.broadcast %cst_40 : f32 to vector<1x128xf32>
    %248 = arith.cmpf ogt, %246, %247 : vector<1x128xf32>
    %cst_41 = arith.constant 0.00999999977 : f32
    %249 = vector.broadcast %cst_41 : f32 to vector<1x128xf32>
    %250 = arith.mulf %249, %246 : vector<1x128xf32>
    %251 = arith.select %248, %246, %250 : vector<1x128xi1>, vector<1x128xf32>
    %c3_42 = arith.constant 3 : index
    %252 = memref.load %arg1[%c3_42] : memref<48xf32, #tpu.memory_space<smem>>
    %253 = vector.broadcast %252 : f32 to vector<1x128xf32>
    %254 = arith.mulf %205, %253 : vector<1x128xf32>
    %c11_43 = arith.constant 11 : index
    %255 = memref.load %arg1[%c11_43] : memref<48xf32, #tpu.memory_space<smem>>
    %256 = vector.broadcast %255 : f32 to vector<1x128xf32>
    %257 = arith.mulf %206, %256 : vector<1x128xf32>
    %258 = arith.addf %254, %257 : vector<1x128xf32>
    %c19_44 = arith.constant 19 : index
    %259 = memref.load %arg1[%c19_44] : memref<48xf32, #tpu.memory_space<smem>>
    %260 = vector.broadcast %259 : f32 to vector<1x128xf32>
    %261 = arith.addf %258, %260 : vector<1x128xf32>
    %cst_45 = arith.constant 0.000000e+00 : f32
    %262 = vector.broadcast %cst_45 : f32 to vector<1x128xf32>
    %263 = arith.cmpf ogt, %261, %262 : vector<1x128xf32>
    %cst_46 = arith.constant 0.00999999977 : f32
    %264 = vector.broadcast %cst_46 : f32 to vector<1x128xf32>
    %265 = arith.mulf %264, %261 : vector<1x128xf32>
    %266 = arith.select %263, %261, %265 : vector<1x128xi1>, vector<1x128xf32>
    %c4_47 = arith.constant 4 : index
    %267 = memref.load %arg1[%c4_47] : memref<48xf32, #tpu.memory_space<smem>>
    %268 = vector.broadcast %267 : f32 to vector<1x128xf32>
    %269 = arith.mulf %205, %268 : vector<1x128xf32>
    %c12_48 = arith.constant 12 : index
    %270 = memref.load %arg1[%c12_48] : memref<48xf32, #tpu.memory_space<smem>>
    %271 = vector.broadcast %270 : f32 to vector<1x128xf32>
    %272 = arith.mulf %206, %271 : vector<1x128xf32>
    %273 = arith.addf %269, %272 : vector<1x128xf32>
    %c20_49 = arith.constant 20 : index
    %274 = memref.load %arg1[%c20_49] : memref<48xf32, #tpu.memory_space<smem>>
    %275 = vector.broadcast %274 : f32 to vector<1x128xf32>
    %276 = arith.addf %273, %275 : vector<1x128xf32>
    %cst_50 = arith.constant 0.000000e+00 : f32
    %277 = vector.broadcast %cst_50 : f32 to vector<1x128xf32>
    %278 = arith.cmpf ogt, %276, %277 : vector<1x128xf32>
    %cst_51 = arith.constant 0.00999999977 : f32
    %279 = vector.broadcast %cst_51 : f32 to vector<1x128xf32>
    %280 = arith.mulf %279, %276 : vector<1x128xf32>
    %281 = arith.select %278, %276, %280 : vector<1x128xi1>, vector<1x128xf32>
    %c5_52 = arith.constant 5 : index
    %282 = memref.load %arg1[%c5_52] : memref<48xf32, #tpu.memory_space<smem>>
    %283 = vector.broadcast %282 : f32 to vector<1x128xf32>
    %284 = arith.mulf %205, %283 : vector<1x128xf32>
    %c13_53 = arith.constant 13 : index
    %285 = memref.load %arg1[%c13_53] : memref<48xf32, #tpu.memory_space<smem>>
    %286 = vector.broadcast %285 : f32 to vector<1x128xf32>
    %287 = arith.mulf %206, %286 : vector<1x128xf32>
    %288 = arith.addf %284, %287 : vector<1x128xf32>
    %c21_54 = arith.constant 21 : index
    %289 = memref.load %arg1[%c21_54] : memref<48xf32, #tpu.memory_space<smem>>
    %290 = vector.broadcast %289 : f32 to vector<1x128xf32>
    %291 = arith.addf %288, %290 : vector<1x128xf32>
    %cst_55 = arith.constant 0.000000e+00 : f32
    %292 = vector.broadcast %cst_55 : f32 to vector<1x128xf32>
    %293 = arith.cmpf ogt, %291, %292 : vector<1x128xf32>
    %cst_56 = arith.constant 0.00999999977 : f32
    %294 = vector.broadcast %cst_56 : f32 to vector<1x128xf32>
    %295 = arith.mulf %294, %291 : vector<1x128xf32>
    %296 = arith.select %293, %291, %295 : vector<1x128xi1>, vector<1x128xf32>
    %c6_57 = arith.constant 6 : index
    %297 = memref.load %arg1[%c6_57] : memref<48xf32, #tpu.memory_space<smem>>
    %298 = vector.broadcast %297 : f32 to vector<1x128xf32>
    %299 = arith.mulf %205, %298 : vector<1x128xf32>
    %c14_58 = arith.constant 14 : index
    %300 = memref.load %arg1[%c14_58] : memref<48xf32, #tpu.memory_space<smem>>
    %301 = vector.broadcast %300 : f32 to vector<1x128xf32>
    %302 = arith.mulf %206, %301 : vector<1x128xf32>
    %303 = arith.addf %299, %302 : vector<1x128xf32>
    %c22_59 = arith.constant 22 : index
    %304 = memref.load %arg1[%c22_59] : memref<48xf32, #tpu.memory_space<smem>>
    %305 = vector.broadcast %304 : f32 to vector<1x128xf32>
    %306 = arith.addf %303, %305 : vector<1x128xf32>
    %cst_60 = arith.constant 0.000000e+00 : f32
    %307 = vector.broadcast %cst_60 : f32 to vector<1x128xf32>
    %308 = arith.cmpf ogt, %306, %307 : vector<1x128xf32>
    %cst_61 = arith.constant 0.00999999977 : f32
    %309 = vector.broadcast %cst_61 : f32 to vector<1x128xf32>
    %310 = arith.mulf %309, %306 : vector<1x128xf32>
    %311 = arith.select %308, %306, %310 : vector<1x128xi1>, vector<1x128xf32>
    %c7_62 = arith.constant 7 : index
    %312 = memref.load %arg1[%c7_62] : memref<48xf32, #tpu.memory_space<smem>>
    %313 = vector.broadcast %312 : f32 to vector<1x128xf32>
    %314 = arith.mulf %205, %313 : vector<1x128xf32>
    %c15_63 = arith.constant 15 : index
    %315 = memref.load %arg1[%c15_63] : memref<48xf32, #tpu.memory_space<smem>>
    %316 = vector.broadcast %315 : f32 to vector<1x128xf32>
    %317 = arith.mulf %206, %316 : vector<1x128xf32>
    %318 = arith.addf %314, %317 : vector<1x128xf32>
    %c23_64 = arith.constant 23 : index
    %319 = memref.load %arg1[%c23_64] : memref<48xf32, #tpu.memory_space<smem>>
    %320 = vector.broadcast %319 : f32 to vector<1x128xf32>
    %321 = arith.addf %318, %320 : vector<1x128xf32>
    %cst_65 = arith.constant 0.000000e+00 : f32
    %322 = vector.broadcast %cst_65 : f32 to vector<1x128xf32>
    %323 = arith.cmpf ogt, %321, %322 : vector<1x128xf32>
    %cst_66 = arith.constant 0.00999999977 : f32
    %324 = vector.broadcast %cst_66 : f32 to vector<1x128xf32>
    %325 = arith.mulf %324, %321 : vector<1x128xf32>
    %326 = arith.select %323, %321, %325 : vector<1x128xi1>, vector<1x128xf32>
    %c24_67 = arith.constant 24 : index
    %327 = memref.load %arg1[%c24_67] : memref<48xf32, #tpu.memory_space<smem>>
    %328 = vector.broadcast %327 : f32 to vector<1x128xf32>
    %329 = arith.mulf %221, %328 : vector<1x128xf32>
    %c40_68 = arith.constant 40 : index
    %330 = memref.load %arg1[%c40_68] : memref<48xf32, #tpu.memory_space<smem>>
    %331 = vector.broadcast %330 : f32 to vector<1x128xf32>
    %332 = arith.addf %329, %331 : vector<1x128xf32>
    %c26_69 = arith.constant 26 : index
    %333 = memref.load %arg1[%c26_69] : memref<48xf32, #tpu.memory_space<smem>>
    %334 = vector.broadcast %333 : f32 to vector<1x128xf32>
    %335 = arith.mulf %236, %334 : vector<1x128xf32>
    %336 = arith.addf %332, %335 : vector<1x128xf32>
    %c28_70 = arith.constant 28 : index
    %337 = memref.load %arg1[%c28_70] : memref<48xf32, #tpu.memory_space<smem>>
    %338 = vector.broadcast %337 : f32 to vector<1x128xf32>
    %339 = arith.mulf %251, %338 : vector<1x128xf32>
    %340 = arith.addf %336, %339 : vector<1x128xf32>
    %c30_71 = arith.constant 30 : index
    %341 = memref.load %arg1[%c30_71] : memref<48xf32, #tpu.memory_space<smem>>
    %342 = vector.broadcast %341 : f32 to vector<1x128xf32>
    %343 = arith.mulf %266, %342 : vector<1x128xf32>
    %344 = arith.addf %340, %343 : vector<1x128xf32>
    %c32_72 = arith.constant 32 : index
    %345 = memref.load %arg1[%c32_72] : memref<48xf32, #tpu.memory_space<smem>>
    %346 = vector.broadcast %345 : f32 to vector<1x128xf32>
    %347 = arith.mulf %281, %346 : vector<1x128xf32>
    %348 = arith.addf %344, %347 : vector<1x128xf32>
    %c34_73 = arith.constant 34 : index
    %349 = memref.load %arg1[%c34_73] : memref<48xf32, #tpu.memory_space<smem>>
    %350 = vector.broadcast %349 : f32 to vector<1x128xf32>
    %351 = arith.mulf %296, %350 : vector<1x128xf32>
    %352 = arith.addf %348, %351 : vector<1x128xf32>
    %c36_74 = arith.constant 36 : index
    %353 = memref.load %arg1[%c36_74] : memref<48xf32, #tpu.memory_space<smem>>
    %354 = vector.broadcast %353 : f32 to vector<1x128xf32>
    %355 = arith.mulf %311, %354 : vector<1x128xf32>
    %356 = arith.addf %352, %355 : vector<1x128xf32>
    %c38_75 = arith.constant 38 : index
    %357 = memref.load %arg1[%c38_75] : memref<48xf32, #tpu.memory_space<smem>>
    %358 = vector.broadcast %357 : f32 to vector<1x128xf32>
    %359 = arith.mulf %326, %358 : vector<1x128xf32>
    %360 = arith.addf %356, %359 : vector<1x128xf32>
    %cst_76 = arith.constant 0.000000e+00 : f32
    %361 = vector.broadcast %cst_76 : f32 to vector<1x128xf32>
    %362 = arith.cmpf ogt, %360, %361 : vector<1x128xf32>
    %cst_77 = arith.constant 0.00999999977 : f32
    %363 = vector.broadcast %cst_77 : f32 to vector<1x128xf32>
    %364 = arith.mulf %363, %360 : vector<1x128xf32>
    %365 = arith.select %362, %360, %364 : vector<1x128xi1>, vector<1x128xf32>
    %c0_78 = arith.constant 0 : index
    %c0_79 = arith.constant 0 : index
    %366 = vector.load %arg5[%c0_78, %c0_79] : memref<2x128xf32, #tpu.memory_space<vmem>>, vector<1x128xf32>
    tpu.vector_store %arg5[%c0_78, %c0_79], %365 {strides = array<i32>} : memref<2x128xf32, #tpu.memory_space<vmem>>, vector<1x128xf32>,
    %c25_80 = arith.constant 25 : index
    %367 = memref.load %arg1[%c25_80] : memref<48xf32, #tpu.memory_space<smem>>
    %368 = vector.broadcast %367 : f32 to vector<1x128xf32>
    %369 = arith.mulf %221, %368 : vector<1x128xf32>
    %c41_81 = arith.constant 41 : index
    %370 = memref.load %arg1[%c41_81] : memref<48xf32, #tpu.memory_space<smem>>
    %371 = vector.broadcast %370 : f32 to vector<1x128xf32>
    %372 = arith.addf %369, %371 : vector<1x128xf32>
    %c27_82 = arith.constant 27 : index
    %373 = memref.load %arg1[%c27_82] : memref<48xf32, #tpu.memory_space<smem>>
    %374 = vector.broadcast %373 : f32 to vector<1x128xf32>
    %375 = arith.mulf %236, %374 : vector<1x128xf32>
    %376 = arith.addf %372, %375 : vector<1x128xf32>
    %c29_83 = arith.constant 29 : index
    %377 = memref.load %arg1[%c29_83] : memref<48xf32, #tpu.memory_space<smem>>
    %378 = vector.broadcast %377 : f32 to vector<1x128xf32>
    %379 = arith.mulf %251, %378 : vector<1x128xf32>
    %380 = arith.addf %376, %379 : vector<1x128xf32>
    %c31_84 = arith.constant 31 : index
    %381 = memref.load %arg1[%c31_84] : memref<48xf32, #tpu.memory_space<smem>>
    %382 = vector.broadcast %381 : f32 to vector<1x128xf32>
    %383 = arith.mulf %266, %382 : vector<1x128xf32>
    %384 = arith.addf %380, %383 : vector<1x128xf32>
    %c33_85 = arith.constant 33 : index
    %385 = memref.load %arg1[%c33_85] : memref<48xf32, #tpu.memory_space<smem>>
    %386 = vector.broadcast %385 : f32 to vector<1x128xf32>
    %387 = arith.mulf %281, %386 : vector<1x128xf32>
    %388 = arith.addf %384, %387 : vector<1x128xf32>
    %c35_86 = arith.constant 35 : index
    %389 = memref.load %arg1[%c35_86] : memref<48xf32, #tpu.memory_space<smem>>
    %390 = vector.broadcast %389 : f32 to vector<1x128xf32>
    %391 = arith.mulf %296, %390 : vector<1x128xf32>
    %392 = arith.addf %388, %391 : vector<1x128xf32>
    %c37_87 = arith.constant 37 : index
    %393 = memref.load %arg1[%c37_87] : memref<48xf32, #tpu.memory_space<smem>>
    %394 = vector.broadcast %393 : f32 to vector<1x128xf32>
    %395 = arith.mulf %311, %394 : vector<1x128xf32>
    %396 = arith.addf %392, %395 : vector<1x128xf32>
    %c39_88 = arith.constant 39 : index
    %397 = memref.load %arg1[%c39_88] : memref<48xf32, #tpu.memory_space<smem>>
    %398 = vector.broadcast %397 : f32 to vector<1x128xf32>
    %399 = arith.mulf %326, %398 : vector<1x128xf32>
    %400 = arith.addf %396, %399 : vector<1x128xf32>
    %cst_89 = arith.constant 0.000000e+00 : f32
    %401 = vector.broadcast %cst_89 : f32 to vector<1x128xf32>
    %402 = arith.cmpf ogt, %400, %401 : vector<1x128xf32>
    %cst_90 = arith.constant 0.00999999977 : f32
    %403 = vector.broadcast %cst_90 : f32 to vector<1x128xf32>
    %404 = arith.mulf %403, %400 : vector<1x128xf32>
    %405 = arith.select %402, %400, %404 : vector<1x128xi1>, vector<1x128xf32>
    %c1_91 = arith.constant 1 : index
    %c0_92 = arith.constant 0 : index
    %406 = vector.load %arg5[%c1_91, %c0_92] : memref<2x128xf32, #tpu.memory_space<vmem>>, vector<1x128xf32>
    tpu.vector_store %arg5[%c1_91, %c0_92], %405 {strides = array<i32>} : memref<2x128xf32, #tpu.memory_space<vmem>>, vector<1x128xf32>,
    return
  }
  func.func @transform_0(%arg0: i32) -> i32 {
    %c0_i32 = arith.constant 0 : i32
    %c0_i32_0 = arith.constant 0 : i32
    return %c0_i32 : i32
  }
  func.func @transform_1(%arg0: i32) -> (i32, i32) {
    %c0_i32 = arith.constant 0 : i32
    %c0_i32_0 = arith.constant 0 : i32
    return %c0_i32, %arg0 : i32, i32
  }
  func.func @transform_2(%arg0: i32) -> (i32, i32) {
    %c0_i32 = arith.constant 0 : i32
    %c0_i32_0 = arith.constant 0 : i32
    return %c0_i32, %arg0 : i32, i32
  }
  func.func @transform_3(%arg0: i32) -> (i32, i32) {
    %c0_i32 = arith.constant 0 : i32
    %c0_i32_0 = arith.constant 0 : i32
    return %c0_i32, %arg0 : i32, i32
  }
  func.func @transform_4(%arg0: i32) -> (i32, i32) {
    %c0_i32 = arith.constant 0 : i32
    %c0_i32_0 = arith.constant 0 : i32
    return %c0_i32, %arg0 : i32, i32
  }
}

</mosaic_0001>

<bundles_post_ra>
// kernel: net_forward.1
= control target key start
LH: loop header
LB: loop body
LE: loop exit
PB: predicated region body
PF: predicated region fallthrough
CT: control target
= control target key end

     0   :  { %s935_s0 = inlined_call_operand.vmem [shape: f32[48], index: 0, kind: input, shape index: {}]   ;;  %s936_s1 = inlined_call_operand.vmem [shape: f32[2,128], index: 1, kind: input, shape index: {}]   ;;  %s937_s2 = inlined_call_operand.vmem [shape: f32[2,128], index: 2, kind: input, shape index: {}]   ;;  %s938_s3 = inlined_call_operand.vmem [shape: f32[2,128], index: 3, kind: output, shape index: {0}]   ;;  %s939_s4 = inlined_call_operand.vmem [shape: f32[2,128], index: 4, kind: output, shape index: {1}]  }
   0x1   :  { %951 = sst [smem:[#allocation15_spill]] %s939_s4 }
   0x2   :  { %10 = vsyncpa [#allocation3], 0  ;;  %s17_s17 = sshll.u32 %s935_s0, 4  ;;  %s18_s17 = int_to_ptr.vmem [resolvable:$true] %s17_s17 }
   0x3   :  { %s532_s18 = scalar_lea.vmem %s18_s17, 16  ;;  %p537_p1 = scmp.lt.s32.totalorder %s18_s17, %s18_s17 }
   0x4   :  { %p533_p0 = scmp.ne.s32.totalorder %s18_s17, %s532_s18  ;;  %p538_p2 = scmp.lt.s32.totalorder %s532_s18, %s532_s18 }
   0x6   :  { %p539_p3 = por %p538_p2, %p537_p1 }
   0x8   :  { %p540_p4 = pnand %p539_p3, %p533_p0 }
   0xa   :  { %543 = shalt.err (!%p540_p4)
}
   0xb   :  { %s546_s19 = smov [#allocation2]  }
   0xc   :  { %20 = dma.vmem_to_smem %s18_s17, 16, %s546_s19, [#allocation3]  }
   0xd   :  { %544 = dma.done.wait [#allocation3], 16  }
   0xe   :  { %545 = vsyncadd [#allocation3], 4294967280 }
   0xf   :  { %28 = sfence }
  0x10   :  { %s32_s20 = sld [smem:[#allocation2]]  ;;  %v578_v0 = vld [vmem:[%s936_s1] sm:$0x3]  ;;  %s585_s26 = sld [smem:[#allocation2 + $0x1]] }
  0x11   :  { %s449_s0 = sld [smem:[#allocation2 + $0x8]]  ;;  %v30_v1 = vld [vmem:[%s937_s2] sm:$0x3]  ;;  %s587_s27 = sld [smem:[#allocation2 + $0x9]] }
  0x12   :  { %s580_s23 = sld [smem:[#allocation2 + $0x10]]  ;;  %s589_s28 = sld [smem:[#allocation2 + $0x11]]  ;;  %v598_v2 = vadd.f32 %v30_v1, %v578_v0 }
  0x13   :  { %s591_s29 = sld [smem:[#allocation2 + $0x2]]  ;;  %s600_s2 = sld [smem:[#allocation2 + $0x3]] }
  0x14   :  { %s593_s1 = sld [smem:[#allocation2 + $0xa]]  ;;  %s602_s5 = sld [smem:[#allocation2 + $0xb]] }
  0x15   :  { %s595_s30 = sld [smem:[#allocation2 + $0x12]]  ;;  %s604_s6 = sld [smem:[#allocation2 + $0x4]] }
  0x16   :  { %v33_v3 = vstv %s32_s20  ;;  %s608_s7 = sld [smem:[#allocation2 + $0x13]]  ;;  %s610_s8 = sld [smem:[#allocation2 + $0xc]]  ;;  %v49_v8 = vstv %s585_s26 }
  0x17   :  { %v34_v4 = vmul.f32 %v33_v3, %v578_v0  ;;  %v36_v5 = vstv %s449_s0  ;;  %v52_v9 = vstv %s587_s27  ;;  %s615_s9 = sld [smem:[#allocation2 + $0x5]]  ;;  %v618_v10 = vmul.f32 %v33_v3, %v598_v2  ;;  %s627_s10 = sld [smem:[#allocation2 + $0x14]] }
  0x18   :  { %v43_v6 = vstv %s580_s23  ;;  %v37_v7 = vmul.f32 %v36_v5, %v578_v0  ;;  %v50_v11 = vmul.f32 %v49_v8, %v578_v0  ;;  %v53_v12 = vmul.f32 %v52_v9, %v578_v0  ;;  %s637_s11 = sld [smem:[#allocation2 + $0xd]]  ;;  %s655_s13 = sld [smem:[#allocation2 + $0x6]] }
  0x19   :  { %v65_v13 = vstv %s591_s29  ;;  %v630_v14 = vmul.f32 %v36_v5, %v598_v2  ;;  %v59_v16 = vstv %s589_s28  ;;  %v81_v21 = vstv %s600_s2  ;;  %s651_s12 = sld [smem:[#allocation2 + $0x15]]  ;;  %s657_s14 = sld [smem:[#allocation2 + $0xe]] }
  0x1a   :  { %v39_v15 = vrot.slane %v37_v7, 1  ;;  %v66_v17 = vmul.f32 %v65_v13, %v578_v0  ;;  %v68_v18 = vstv %s593_s1  ;;  %v55_v19 = vrot.slane %v53_v12, 1  ;;  %s667_s15 = sld [smem:[#allocation2 + $0x16]]  ;;  %s669_s16 = sld [smem:[#allocation2 + $0x7]] }
  0x1b   :  { %v69_v20 = vmul.f32 %v68_v18, %v578_v0  ;;  %v84_v22 = vstv %s602_s5  ;;  %v75_v24 = vstv %s595_s30  ;;  %v82_v25 = vmul.f32 %v81_v21, %v578_v0  ;;  %s675_s17 = sld [smem:[#allocation2 + $0xf]]  ;;  %s679_s19 = sld [smem:[#allocation2 + $0x18]] }
  0x1c   :  { %v41_v23 = vadd.f32 %v39_v15, %v34_v4  ;;  %v85_v26 = vmul.f32 %v84_v22, %v578_v0  ;;  %v57_v27 = vadd.f32 %v55_v19, %v50_v11  ;;  %v97_v29 = vstv %s604_s6  ;;  %s677_s18 = sld [smem:[#allocation2 + $0x17]]  ;;  %s684_s20 = sld [smem:[#allocation2 + $0x28]] }
  0x1d   :  { %952 = sst [smem:[#allocation5_spill]] %s627_s10  ;;  %v71_v28 = vrot.slane %v69_v20, 1  ;;  %v100_v30 = vstv %s610_s8  ;;  %v98_v33 = vmul.f32 %v97_v29, %v578_v0  ;;  %v91_v37 = vstv %s608_s7  ;;  %s692_s21 = sld [smem:[#allocation2 + $0x1a]] }
  0x1e   :  { %v44_v31 = vadd.f32 %v43_v6, %v41_v23  ;;  %v87_v32 = vrot.slane %v85_v26, 1  ;;  %v101_v34 = vmul.f32 %v100_v30, %v578_v0  ;;  %v60_v35 = vadd.f32 %v59_v16, %v57_v27  ;;  %s694_s22 = sld [smem:[#allocation2 + $0x1c]]  ;;  %s706_s0 = sld [smem:[#allocation2 + $0x1e]] }
  0x1f   :  { %953 = sst [smem:[#allocation6_spill]] %s651_s12  ;;  %v73_v36 = vadd.f32 %v71_v28, %v66_v17  ;;  %v113_v38 = vstv %s615_s9  ;;  %v107_v44 = vstv %s627_s10  ;;  %v116_v48 = vstv %s637_s11  ;;  %s711_s24 = sld [smem:[#allocation2 + $0x20]] }
  0x20   :  { %954 = sst [smem:[#allocation7_spill]] %s657_s14  ;;  %vm45_vm0 = vcmp.gt.f32.partialorder %v44_v31, 0.0  ;;  %v46_v39 = vmul.f32 0.01, %v44_v31  ;;  %v89_v40 = vadd.f32 %v87_v32, %v82_v25  ;;  %v103_v41 = vrot.slane %v101_v34, 1  ;;  %s726_s4 = sld [smem:[#allocation2 + $0x24]] }
  0x21   :  { %955 = sst [smem:[#allocation8_spill]] %s669_s16  ;;  %vm61_vm1 = vcmp.gt.f32.partialorder %v60_v35, 0.0  ;;  %v62_v42 = vmul.f32 0.01, %v60_v35  ;;  %v76_v43 = vadd.f32 %v75_v24, %v73_v36  ;;  %v114_v47 = vmul.f32 %v113_v38, %v578_v0  ;;  %s717_s25 = sld [smem:[#allocation2 + $0x22]] }
  0x22   :  { %956 = sst [smem:[#allocation9_spill]] %s675_s17  ;;  %v92_v45 = vadd.f32 %v91_v37, %v89_v40  ;;  %v105_v46 = vadd.f32 %v103_v41, %v98_v33  ;;  %v697_v49 = vsel %vm45_vm0, %v44_v31, %v46_v39  ;;  %v117_v51 = vmul.f32 %v116_v48, %v578_v0  ;;  %s734_s10 = sld [smem:[#allocation2 + $0x19]] }
  0x23   :  { %957 = sst [smem:[#allocation10_spill]] %s679_s19  ;;  %vm77_vm2 = vcmp.gt.f32.partialorder %v76_v43, 0.0  ;;  %v78_v50 = vmul.f32 0.01, %v76_v43  ;;  %v702_v52 = vsel %vm61_vm1, %v60_v35, %v62_v42  ;;  %v123_v56 = vstv %s651_s12  ;;  %s750_s12 = sld [smem:[#allocation2 + $0x29]] }
  0x24   :  { %958 = sst [smem:[#allocation11_spill]] %s684_s20  ;;  %vm93_vm3 = vcmp.gt.f32.partialorder %v92_v45, 0.0  ;;  %v94_v53 = vmul.f32 0.01, %v92_v45  ;;  %v108_v54 = vadd.f32 %v107_v44, %v105_v46  ;;  %v119_v55 = vrot.slane %v117_v51, 1 }
  0x25   :  { %959 = sst [smem:[#allocation12_spill]] %s692_s21  ;;  %v129_v57 = vstv %s655_s13  ;;  %v132_v58 = vstv %s657_s14  ;;  %v713_v59 = vsel %vm77_vm2, %v76_v43, %v78_v50  ;;  %v145_v3 = vstv %s669_s16  ;;  %s742_s14 = sld [smem:[#allocation2 + $0x26]] }
  0x26   :  { %960 = sst [smem:[#allocation13_spill]] %s694_s22  ;;  %v715_v60 = vsel %vm93_vm3, %v92_v45, %v94_v53  ;;  %vm109_vm4 = vcmp.gt.f32.partialorder %v108_v54, 0.0  ;;  %v110_v61 = vmul.f32 0.01, %v108_v54  ;;  %v121_v62 = vadd.f32 %v119_v55, %v114_v47  ;;  %s752_s16 = sld [smem:[#allocation2 + $0x1b]] }
  0x27   :  { %961 = sst [smem:[#allocation14_spill]] %s706_s0  ;;  %v130_v63 = vmul.f32 %v129_v57, %v578_v0  ;;  %v133_v1 = vmul.f32 %v132_v58, %v578_v0  ;;  %v139_v4 = vstv %s667_s15  ;;  %v146_v5 = vmul.f32 %v145_v3, %v578_v0 }
  0x28   :  { %v148_v7 = vstv %s675_s17  ;;  %v155_v11 = vstv %s677_s18  ;;  %v124_v12 = vadd.f32 %v123_v56, %v121_v62  ;;  %v161_v19 = vstv %s679_s19  ;;  %s754_s17 = sld [smem:[#allocation2 + $0x1d]]  ;;  %s765_s19 = sld [smem:[#allocation2 + $0x1f]] }
  0x29   :  { %v135_v15 = vrot.slane %v133_v1, 1  ;;  %v149_v17 = vmul.f32 %v148_v7, %v578_v0  ;;  %v162_v20 = vmul.f32 %v161_v19, %v697_v49  ;;  %v164_v23 = vstv %s684_s20  ;;  %s770_s20 = sld [smem:[#allocation2 + $0x21]] }
  0x2a   :  { %v167_v25 = vstv %s692_s21  ;;  %v171_v26 = vstv %s694_s22  ;;  %vm125_vm5 = vcmp.gt.f32.partialorder %v124_v12, 0.0  ;;  %v126_v27 = vmul.f32 0.01, %v124_v12  ;;  %s772_s21 = sld [smem:[#allocation2 + $0x23]]  ;;  %s779_s22 = sld [smem:[#allocation2 + $0x25]] }
  0x2b   :  { %v137_v0 = vadd.f32 %v135_v15, %v130_v63  ;;  %v151_v28 = vrot.slane %v149_v17, 1  ;;  %v165_v31 = vadd.f32 %v164_v23, %v162_v20  ;;  %v168_v32 = vmul.f32 %v167_v25, %v702_v52 }
  0x2c   :  { %v172_v33 = vmul.f32 %v171_v26, %v713_v59  ;;  %v175_v34 = vstv %s706_s0  ;;  %v111_v35 = vsel %vm109_vm4, %v108_v54, %v110_v61  ;;  %v127_v36 = vsel %vm125_vm5, %v124_v12, %v126_v27  ;;  %s789_s0 = sld [smem:[#allocation2 + $0x27]] }
  0x2d   :  { %v140_v39 = vadd.f32 %v139_v4, %v137_v0  ;;  %v153_v40 = vadd.f32 %v151_v28, %v146_v5  ;;  %v169_v41 = vadd.f32 %v168_v32, %v165_v31  ;;  %v176_v42 = vmul.f32 %v175_v34, %v715_v60 }
  0x2e   :  { %v179_v43 = vstv %s711_s24  ;;  %v183_v45 = vstv %s717_s25  ;;  %v187_v50 = vstv %s726_s4  ;;  %v199_v55 = vstv %s734_s10  ;;  %s972_s10 = sld [smem:[#allocation15_spill]] }
  0x2f   :  { %vm141_vm6 = vcmp.gt.f32.partialorder %v140_v39, 0.0  ;;  %v142_v46 = vmul.f32 0.01, %v140_v39  ;;  %v156_v47 = vadd.f32 %v155_v11, %v153_v40  ;;  %v173_v51 = vadd.f32 %v172_v33, %v169_v41 }
  0x30   :  { %v180_v53 = vmul.f32 %v179_v43, %v111_v35  ;;  %v184_v54 = vmul.f32 %v183_v45, %v127_v36  ;;  %v200_v63 = vmul.f32 %v199_v55, %v697_v49  ;;  %v191_v5 = vstv %s742_s14 }
  0x31   :  { %v143_v61 = vsel %vm141_vm6, %v140_v39, %v142_v46  ;;  %vm157_vm7 = vcmp.gt.f32.partialorder %v156_v47, 0.0  ;;  %v158_v62 = vmul.f32 0.01, %v156_v47  ;;  %v177_v1 = vadd.f32 %v176_v42, %v173_v51 }
  0x32   :  { %v202_v12 = vstv %s750_s12  ;;  %v205_v15 = vstv %s752_s16  ;;  %v209_v0 = vstv %s754_s17  ;;  %v188_v49 = vmul.f32 %v187_v50, %v143_v61 }
  0x33   :  { %v159_v17 = vsel %vm157_vm7, %v156_v47, %v158_v62  ;;  %v203_v20 = vadd.f32 %v202_v12, %v200_v63  ;;  %v206_v27 = vmul.f32 %v205_v15, %v702_v52  ;;  %v181_v28 = vadd.f32 %v180_v53, %v177_v1 }
  0x34   :  { %v210_v31 = vmul.f32 %v209_v0, %v713_v59  ;;  %v213_v32 = vstv %s765_s19  ;;  %v217_v40 = vstv %s770_s20  ;;  %v221_v41 = vstv %s772_s21 }
  0x35   :  { %v207_v33 = vadd.f32 %v206_v27, %v203_v20  ;;  %v214_v39 = vmul.f32 %v213_v32, %v715_v60  ;;  %v185_v52 = vadd.f32 %v184_v54, %v181_v28  ;;  %v192_v42 = vmul.f32 %v191_v5, %v159_v17 }
  0x36   :  { %v218_v46 = vmul.f32 %v217_v40, %v111_v35  ;;  %v225_v47 = vstv %s779_s22  ;;  %v222_v51 = vmul.f32 %v221_v41, %v127_v36  ;;  %v243_v60 = vrot.slane %v630_v14, 1 }
  0x37   :  { %v211_v59 = vadd.f32 %v210_v31, %v207_v33  ;;  %v226_v53 = vmul.f32 %v225_v47, %v143_v61  ;;  %v189_v62 = vadd.f32 %v188_v49, %v185_v52  ;;  %v229_v63 = vstv %s789_s0 }
  0x38   :  { %v254_v54 = vmul.f32 %v49_v8, %v598_v2  ;;  %v257_v35 = vmul.f32 %v52_v9, %v598_v2  ;;  %v245_v20 = vadd.f32 %v243_v60, %v618_v10  ;;  %v270_v36 = vmul.f32 %v65_v13, %v598_v2 }
  0x39   :  { %v215_v1 = vadd.f32 %v214_v39, %v211_v59  ;;  %v273_v61 = vmul.f32 %v68_v18, %v598_v2  ;;  %v193_v27 = vadd.f32 %v192_v42, %v189_v62  ;;  %v286_v28 = vmul.f32 %v81_v21, %v598_v2 }
  0x3a   :  { %v259_v14 = vrot.slane %v257_v35, 1  ;;  %v289_v8 = vmul.f32 %v84_v22, %v598_v2  ;;  %v230_v10 = vmul.f32 %v229_v63, %v159_v17  ;;  %v248_v49 = vadd.f32 %v245_v20, %v43_v6 }
  0x3b   :  { %v219_v9 = vadd.f32 %v218_v46, %v215_v1  ;;  %v275_v13 = vrot.slane %v273_v61, 1  ;;  %vm194_vm8 = vcmp.gt.f32.partialorder %v193_v27, 0.0  ;;  %v195_v18 = vmul.f32 0.01, %v193_v27 }
  0x3c   :  { %v261_v31 = vadd.f32 %v259_v14, %v254_v54  ;;  %v291_v33 = vrot.slane %v289_v8, 1  ;;  %v250_v52 = vmul.f32 0.01, %v248_v49  ;;  %v302_v22 = vmul.f32 %v97_v29, %v598_v2 }
  0x3d   :  { %v223_v39 = vadd.f32 %v222_v51, %v219_v9  ;;  %v277_v21 = vadd.f32 %v275_v13, %v270_v36  ;;  %v196_v42 = vsel %vm194_vm8, %v193_v27, %v195_v18  ;;  %v305_v6 = vmul.f32 %v100_v30, %v598_v2 }
  0x3e   :  { %v264_v17 = vadd.f32 %v261_v31, %v59_v16  ;;  %v293_v46 = vadd.f32 %v291_v33, %v286_v28  ;;  %197 = vst [vmem:[%s938_s3] sm:$0x1] %v196_v42  ;;  %vm249_vm9 = vcmp.gt.f32.partialorder %v248_v49, 0.0  ;;  %v318_v60 = vmul.f32 %v113_v38, %v598_v2 }
  0x3f   :  { %v227_v59 = vadd.f32 %v226_v53, %v223_v39  ;;  %v280_v51 = vadd.f32 %v277_v21, %v75_v24  ;;  %v307_v62 = vrot.slane %v305_v6, 1  ;;  %v321_v53 = vmul.f32 %v116_v48, %v598_v2 }
  0x40   :  { %vm265_vm10 = vcmp.gt.f32.partialorder %v264_v17, 0.0  ;;  %v266_v29 = vmul.f32 0.01, %v264_v17  ;;  %v296_v16 = vadd.f32 %v293_v46, %v91_v37  ;;  %v251_v24 = vsel %vm249_vm9, %v248_v49, %v250_v52 }
  0x41   :  { %v231_v30 = vadd.f32 %v230_v10, %v227_v59  ;;  %vm281_vm11 = vcmp.gt.f32.partialorder %v280_v51, 0.0  ;;  %v282_v54 = vmul.f32 0.01, %v280_v51  ;;  %v309_v38 = vadd.f32 %v307_v62, %v302_v22 }
  0x42   :  { %v267_v35 = vsel %vm265_vm10, %v264_v17, %v266_v29  ;;  %vm297_vm12 = vcmp.gt.f32.partialorder %v296_v16, 0.0  ;;  %v298_v20 = vmul.f32 0.01, %v296_v16  ;;  %v323_v37 = vrot.slane %v321_v53, 1 }
  0x43   :  { %vm232_vm13 = vcmp.gt.f32.partialorder %v231_v30, 0.0  ;;  %v233_v1 = vmul.f32 0.01, %v231_v30  ;;  %v283_v36 = vsel %vm281_vm11, %v280_v51, %v282_v54  ;;  %v312_v61 = vadd.f32 %v309_v38, %v107_v44 }
  0x44   :  { %v334_v27 = vmul.f32 %v129_v57, %v598_v2  ;;  %v337_v48 = vmul.f32 %v132_v58, %v598_v2  ;;  %v325_v28 = vadd.f32 %v323_v37, %v318_v60  ;;  %v350_v8 = vmul.f32 %v145_v3, %v598_v2 }
  0x45   :  { %v234_v14 = vsel %vm232_vm13, %v231_v30, %v233_v1  ;;  %v353_v9 = vmul.f32 %v148_v7, %v598_v2  ;;  %vm313_vm14 = vcmp.gt.f32.partialorder %v312_v61, 0.0  ;;  %v314_v44 = vmul.f32 0.01, %v312_v61 }
  0x46   :  { %235 = vst [vmem:[%s938_s3 + $0x1] sm:$0x1] %v234_v14  ;;  %v339_v57 = vrot.slane %v337_v48, 1  ;;  %v366_v58 = vmul.f32 %v251_v24, %v161_v19  ;;  %v299_v10 = vsel %vm297_vm12, %v296_v16, %v298_v20  ;;  %v328_v3 = vadd.f32 %v325_v28, %v123_v56 }
  0x47   :  { %v355_v49 = vrot.slane %v353_v9, 1  ;;  %v372_v2 = vmul.f32 %v267_v35, %v167_v25  ;;  %v376_v18 = vmul.f32 %v283_v36, %v171_v26  ;;  %v315_v31 = vsel %vm313_vm14, %v312_v61, %v314_v44 }
  0x48   :  { %v341_v7 = vadd.f32 %v339_v57, %v334_v27  ;;  %v369_v13 = vadd.f32 %v366_v58, %v164_v23  ;;  %vm329_vm15 = vcmp.gt.f32.partialorder %v328_v3, 0.0  ;;  %v330_v33 = vmul.f32 0.01, %v328_v3 }
  0x49   :  { %v357_v19 = vadd.f32 %v355_v49, %v350_v8  ;;  %v380_v56 = vmul.f32 %v299_v10, %v175_v34  ;;  %v404_v25 = vmul.f32 %v251_v24, %v199_v55  ;;  %v410_v26 = vmul.f32 %v267_v35, %v205_v15 }
  0x4a   :  { %v344_v39 = vadd.f32 %v341_v7, %v139_v4  ;;  %v373_v52 = vadd.f32 %v372_v2, %v369_v13  ;;  %v331_v21 = vsel %vm329_vm15, %v328_v3, %v330_v33  ;;  %v384_v17 = vmul.f32 %v315_v31, %v179_v43 }
  0x4b   :  { %v360_v23 = vadd.f32 %v357_v19, %v155_v11  ;;  %v407_v34 = vadd.f32 %v404_v25, %v202_v12  ;;  %v414_v55 = vmul.f32 %v283_v36, %v209_v0  ;;  %v388_v15 = vmul.f32 %v331_v21, %v183_v45 }
  0x4c   :  { %vm345_vm0 = vcmp.gt.f32.partialorder %v344_v39, 0.0  ;;  %v346_v22 = vmul.f32 0.01, %v344_v39  ;;  %v377_v42 = vadd.f32 %v376_v18, %v373_v52  ;;  %v418_v51 = vmul.f32 %v299_v10, %v213_v32 }
  0x4d   :  { %vm361_vm1 = vcmp.gt.f32.partialorder %v360_v23, 0.0  ;;  %v362_v4 = vmul.f32 0.01, %v360_v23  ;;  %v411_v59 = vadd.f32 %v410_v26, %v407_v34  ;;  %v422_v16 = vmul.f32 %v315_v31, %v217_v40 }
  0x4e   :  { %v347_v46 = vsel %vm345_vm0, %v344_v39, %v346_v22  ;;  %v381_v11 = vadd.f32 %v380_v56, %v377_v42  ;;  %v426_v30 = vmul.f32 %v331_v21, %v221_v41 }
  0x4f   :  { %v363_v6 = vsel %vm361_vm1, %v360_v23, %v362_v4  ;;  %v392_v43 = vmul.f32 %v347_v46, %v187_v50  ;;  %v415_v29 = vadd.f32 %v414_v55, %v411_v59  ;;  %v430_v45 = vmul.f32 %v347_v46, %v225_v47 }
  0x50   :  { %v385_v60 = vadd.f32 %v384_v17, %v381_v11  ;;  %v396_v12 = vmul.f32 %v363_v6, %v191_v5  ;;  %v434_v32 = vmul.f32 %v363_v6, %v229_v63 }
  0x51   :  { %v419_v0 = vadd.f32 %v418_v51, %v415_v29 }
  0x52   :  { %v389_v62 = vadd.f32 %v388_v15, %v385_v60 }
  0x53   :  { %v423_v53 = vadd.f32 %v422_v16, %v419_v0 }
  0x54   :  { %v393_v54 = vadd.f32 %v392_v43, %v389_v62 }
  0x55   :  { %v427_v35 = vadd.f32 %v426_v30, %v423_v53 }
  0x56   :  { %v397_v24 = vadd.f32 %v396_v12, %v393_v54 }
  0x57   :  { %v431_v50 = vadd.f32 %v430_v45, %v427_v35 }
  0x58   :  { %vm398_vm2 = vcmp.gt.f32.partialorder %v397_v24, 0.0  ;;  %v399_v38 = vmul.f32 0.01, %v397_v24 }
  0x59   :  { %v435_v5 = vadd.f32 %v434_v32, %v431_v50 }
  0x5a   :  { %v400_v1 = vsel %vm398_vm2, %v397_v24, %v399_v38 }
  0x5b   :  { %401 = vst [vmem:[%s972_s10] sm:$0x1] %v400_v1  ;;  %vm436_vm3 = vcmp.gt.f32.partialorder %v435_v5, 0.0  ;;  %v437_v40 = vmul.f32 0.01, %v435_v5 }
  0x5d   :  { %v438_v41 = vsel %vm436_vm3, %v435_v5, %v437_v40 }
  0x5e   :  { %439 = vst [vmem:[%s972_s10 + $0x1] sm:$0x1] %v438_v41 }
  0x5f   :  { %448 = vsyncpa [#allocation3], 1 }

</bundles_post_ra>
